<compile_context>
chip_gen: v6e
topology: v6e:2x2x1
jax: 0.10.0
libtpu: 0.0.40
codegen_flags: <defaults>
</compile_context>

<pallas_src>
import jax
import jax.numpy as jnp
from jax.experimental import pallas as pl
from jax.experimental.pallas import tpu as pltpu

LANE = 128


def _round_up(x, m):
    return ((x + m - 1) // m) * m


def mlp_kernel(x_ref,
               w1_ref, t1_ref, w2_ref, t2_ref,
               w3_ref, t3_ref, w4_ref, t4_ref,
               w5_ref, b5_ref, o_ref):
    """Fused MLP forward for one batch tile:
       4x (bf16 matmul -> f32 acc -> bf16 +shift -> ReLU) -> matmul + bias."""
    h = x_ref[...]                                    # already bf16, K=in_dim

    def layer(h, w_ref, t_ref):
        z = jnp.dot(h, w_ref[...], preferred_element_type=jnp.float32)
        # BN scale folded into W, shift in t (bf16 epilogue: add + ReLU).
        return jnp.maximum(z.astype(jnp.bfloat16) + t_ref[...], 0)

    h = layer(h, w1_ref, t1_ref)
    h = layer(h, w2_ref, t2_ref)
    h = layer(h, w3_ref, t3_ref)
    h = layer(h, w4_ref, t4_ref)
    # Dropout(0.5) -> identity in eval mode.
    o_ref[...] = jnp.dot(h, w5_ref[...], preferred_element_type=jnp.float32) + b5_ref[...]


def init_params(key, in_dim, num_classes, eps=1e-5):
    """Synthetic params matching PyTorch init. Eval-mode BN is folded:
    BN(xW + b) = x(W*s) + t with s = gamma/sqrt(var+eps), t = (b-mean)*s + beta.
    w1 is stored unpadded [in_dim, 512]; hidden 64 is lane-padded to 128 with
    zeros (padded columns stay exactly 0 through ReLU). Weights & shifts bf16."""
    dims = [in_dim, 512, 256, 128, 64]
    in_pads = [in_dim, 512, 256, 128]                # input width of layer n (already lane-ok)
    out_pads = [512, 256, 128, _round_up(64, LANE)]  # output width of layer n (64 -> 128)
    out_pad = _round_up(num_classes, LANE)

    params = {}
    keys = jax.random.split(key, 10)
    ki = 0
    for n in range(1, 5):
        fan_in, fan_out = dims[n - 1], dims[n]
        bound = float(1.0 / (fan_in ** 0.5))
        w = jax.random.uniform(keys[ki], (fan_in, fan_out), jnp.float32, -bound, bound); ki += 1
        b = jax.random.uniform(keys[ki], (fan_out,), jnp.float32, -bound, bound); ki += 1
        # BatchNorm1d defaults: gamma=1, beta=0, running_mean=0, running_var=1.
        gamma = jnp.ones((fan_out,), jnp.float32)
        beta = jnp.zeros((fan_out,), jnp.float32)
        r_mean = jnp.zeros((fan_out,), jnp.float32)
        r_var = jnp.ones((fan_out,), jnp.float32)
        scale = gamma / jnp.sqrt(r_var + eps)
        shift = (b - r_mean) * scale + beta
        w_folded = w * scale[None, :]                 # fold BN scale into weight columns
        w_pad = jnp.zeros((in_pads[n - 1], out_pads[n - 1]), jnp.float32)
        w_pad = w_pad.at[:fan_in, :fan_out].set(w_folded)
        t_pad = jnp.zeros((1, out_pads[n - 1]), jnp.float32).at[0, :fan_out].set(shift)
        params[f"w{n}"] = w_pad.astype(jnp.bfloat16)
        params[f"t{n}"] = t_pad.astype(jnp.bfloat16)  # bf16 epilogue

    # Final Linear(64, num_classes), padded to (128, out_pad).
    bound = float(1.0 / (64 ** 0.5))
    w5 = jax.random.uniform(keys[ki], (64, num_classes), jnp.float32, -bound, bound); ki += 1
    b5 = jax.random.uniform(keys[ki], (num_classes,), jnp.float32, -bound, bound); ki += 1
    w5_pad = jnp.zeros((out_pads[3], out_pad), jnp.float32).at[:64, :num_classes].set(w5)
    b5_pad = jnp.zeros((1, out_pad), jnp.float32).at[0, :num_classes].set(b5)
    params["w5"] = w5_pad.astype(jnp.bfloat16)
    params["b5"] = b5_pad
    params["meta"] = dict(in_dim=in_dim, num_classes=num_classes, out_pad=out_pad)
    return params


def mlp_classifier_forward(x, params, tile_b_max=1024, min_steps=4):
    """x: [B, in_dim] float32 -> [B, num_classes] float32."""
    meta = params["meta"]
    B, in_dim = x.shape
    out_pad, num_classes = meta["out_pad"], meta["num_classes"]

    # Adaptive batch tile: multiple of 16 (bf16 sublane packing), targeting
    # >= min_steps grid steps so the "parallel" axis actually shards across
    # both v7x TensorCores at large B, capped so VMEM stays well under the
    # default scoped limit on every generation (tile_b=1024 -> ~6 MiB).
    target = -(-B // min_steps)                       # cdiv(B, min_steps)
    tile_b = max(16, min(_round_up(target, 16), tile_b_max))
    b_pad = _round_up(B, tile_b)

    # bf16 input, no feature-lane padding: first matmul runs K=in_dim.
    xp = x.astype(jnp.bfloat16)
    if b_pad != B:
        xp = jnp.zeros((b_pad, in_dim), jnp.bfloat16).at[:B].set(xp)

    weight_ops = [params[k] for k in
                  ("w1", "t1", "w2", "t2", "w3", "t3", "w4", "t4", "w5", "b5")]

    grid = (b_pad // tile_b,)
    x_spec = pl.BlockSpec((tile_b, in_dim), lambda i: (i, 0))
    # Constant index_map: weights DMA'd once, stay VMEM-resident across the grid.
    w_specs = [pl.BlockSpec(w.shape, lambda i: (0, 0)) for w in weight_ops]
    out_spec = pl.BlockSpec((tile_b, out_pad), lambda i: (i, 0))

    flops = 2 * b_pad * (in_dim * 512 + 512 * 256 + 256 * 128 + 128 * 128 + 128 * out_pad)
    bytes_accessed = (xp.size * 2
                      + sum(int(w.size) * w.dtype.itemsize for w in weight_ops)
                      + b_pad * out_pad * 4)

    out = pl.pallas_call(
        mlp_kernel,
        out_shape=jax.ShapeDtypeStruct((b_pad, out_pad), jnp.float32),
        grid=grid,
        in_specs=[x_spec] + w_specs,
        out_specs=out_spec,
        compiler_params=pltpu.CompilerParams(
            dimension_semantics=("parallel",)),       # shard batch across TCs on v7x
        cost_estimate=pl.CostEstimate(
            flops=flops, transcendentals=0, bytes_accessed=bytes_accessed),
    )(xp, *weight_ops)
    return out[:B, :num_classes]


def mlp_classifier_ref(x, params):
    """Pure-JAX reference with the same padded bf16 params / same math."""
    meta = params["meta"]
    h = x.astype(jnp.bfloat16)
    for n in range(1, 5):
        z = jnp.dot(h, params[f"w{n}"], preferred_element_type=jnp.float32)
        h = jnp.maximum(z.astype(jnp.bfloat16) + params[f"t{n}"], 0)
    out = jnp.dot(h, params["w5"], preferred_element_type=jnp.float32) + params["b5"]
    return out[:, :meta["num_classes"]]


if __name__ == "__main__":
    B, in_dim, num_classes = 8, 32, 10
    key = jax.random.PRNGKey(0)
    kx, kp = jax.random.split(key)
    x = jax.random.normal(kx, (B, in_dim), jnp.float32)
    params = init_params(kp, in_dim, num_classes)

    out = jax.block_until_ready(mlp_classifier_forward(x, params))
    ref = jax.block_until_ready(mlp_classifier_ref(x, params))

    assert out.shape == (B, num_classes)
    assert jnp.allclose(out, ref, atol=2e-2, rtol=2e-2), "mismatch vs reference"
    print("KERNEL_OK")
</pallas_src>

<mosaic_0001>
module attributes {stable_mosaic.version = 11 : i64} {
  func.func @mlp_kernel(%arg0: i32, %arg1: memref<16x32xbf16, #tpu.memory_space<vmem>>, %arg2: memref<32x512xbf16, #tpu.memory_space<vmem>>, %arg3: memref<1x512xbf16, #tpu.memory_space<vmem>>, %arg4: memref<512x256xbf16, #tpu.memory_space<vmem>>, %arg5: memref<1x256xbf16, #tpu.memory_space<vmem>>, %arg6: memref<256x128xbf16, #tpu.memory_space<vmem>>, %arg7: memref<1x128xbf16, #tpu.memory_space<vmem>>, %arg8: memref<128x128xbf16, #tpu.memory_space<vmem>>, %arg9: memref<1x128xbf16, #tpu.memory_space<vmem>>, %arg10: memref<128x128xbf16, #tpu.memory_space<vmem>>, %arg11: memref<1x128xf32, #tpu.memory_space<vmem>>, %arg12: memref<16x128xf32, #tpu.memory_space<vmem>>) attributes {dimension_semantics = [#tpu.dimension_semantics<parallel>], iteration_bounds = array<i64: 1>, scalar_prefetch = 0 : i64, scratch_operands = 0 : i64, tpu.core_type = #tpu.core_type<tc>, window_params = [{transform_indices = @transform_0, window_bounds = array<i64: 16, 32>}, {pipeline_mode = #tpu.pipeline_mode<synchronous>, transform_indices = @transform_1, window_bounds = array<i64: 32, 512>}, {pipeline_mode = #tpu.pipeline_mode<synchronous>, transform_indices = @transform_2, window_bounds = array<i64: 1, 512>}, {pipeline_mode = #tpu.pipeline_mode<synchronous>, transform_indices = @transform_3, window_bounds = array<i64: 512, 256>}, {pipeline_mode = #tpu.pipeline_mode<synchronous>, transform_indices = @transform_4, window_bounds = array<i64: 1, 256>}, {pipeline_mode = #tpu.pipeline_mode<synchronous>, transform_indices = @transform_5, window_bounds = array<i64: 256, 128>}, {pipeline_mode = #tpu.pipeline_mode<synchronous>, transform_indices = @transform_6, window_bounds = array<i64: 1, 128>}, {pipeline_mode = #tpu.pipeline_mode<synchronous>, transform_indices = @transform_7, window_bounds = array<i64: 128, 128>}, {pipeline_mode = #tpu.pipeline_mode<synchronous>, transform_indices = @transform_8, window_bounds = array<i64: 1, 128>}, {pipeline_mode = #tpu.pipeline_mode<synchronous>, transform_indices = @transform_9, window_bounds = array<i64: 128, 128>}, {pipeline_mode = #tpu.pipeline_mode<synchronous>, transform_indices = @transform_10, window_bounds = array<i64: 1, 128>}, {transform_indices = @transform_11, window_bounds = array<i64: 16, 128>}]} {
    %c0 = arith.constant 0 : index
    %c0_0 = arith.constant 0 : index
    %0 = vector.load %arg1[%c0, %c0_0] : memref<16x32xbf16, #tpu.memory_space<vmem>>, vector<16x32xbf16>
    %c0_1 = arith.constant 0 : index
    %c0_2 = arith.constant 0 : index
    %1 = vector.load %arg2[%c0_1, %c0_2] : memref<32x512xbf16, #tpu.memory_space<vmem>>, vector<32x512xbf16>
    %cst = arith.constant dense<0.000000e+00> : vector<16x512xf32>
    %2 = tpu.matmul %0, %1, %cst {dimension_numbers = #tpu.dot_dimension_numbers<[1], [0], [0], [1], [0, 0, 1, 1], [], []>} : vector<16x32xbf16>, vector<32x512xbf16>, vector<16x512xf32> -> vector<16x512xf32>
    %3 = arith.truncf %2 : vector<16x512xf32> to vector<16x512xbf16>
    %c0_3 = arith.constant 0 : index
    %c0_4 = arith.constant 0 : index
    %4 = vector.load %arg3[%c0_3, %c0_4] : memref<1x512xbf16, #tpu.memory_space<vmem>>, vector<1x512xbf16>
    %5 = vector.broadcast %4 : vector<1x512xbf16> to vector<16x512xbf16>
    %6 = arith.addf %3, %5 : vector<16x512xbf16>
    %cst_5 = arith.constant 0.000000e+00 : bf16
    %7 = vector.broadcast %cst_5 : bf16 to vector<16x512xbf16>
    %8 = arith.maximumf %6, %7 : vector<16x512xbf16>
    %c0_6 = arith.constant 0 : index
    %c0_7 = arith.constant 0 : index
    %9 = vector.load %arg4[%c0_6, %c0_7] : memref<512x256xbf16, #tpu.memory_space<vmem>>, vector<512x256xbf16>
    %cst_8 = arith.constant dense<0.000000e+00> : vector<16x256xf32>
    %10 = tpu.matmul %8, %9, %cst_8 {dimension_numbers = #tpu.dot_dimension_numbers<[1], [0], [0], [1], [0, 0, 1, 1], [], []>} : vector<16x512xbf16>, vector<512x256xbf16>, vector<16x256xf32> -> vector<16x256xf32>
    %11 = arith.truncf %10 : vector<16x256xf32> to vector<16x256xbf16>
    %c0_9 = arith.constant 0 : index
    %c0_10 = arith.constant 0 : index
    %12 = vector.load %arg5[%c0_9, %c0_10] : memref<1x256xbf16, #tpu.memory_space<vmem>>, vector<1x256xbf16>
    %13 = vector.broadcast %12 : vector<1x256xbf16> to vector<16x256xbf16>
    %14 = arith.addf %11, %13 : vector<16x256xbf16>
    %cst_11 = arith.constant 0.000000e+00 : bf16
    %15 = vector.broadcast %cst_11 : bf16 to vector<16x256xbf16>
    %16 = arith.maximumf %14, %15 : vector<16x256xbf16>
    %c0_12 = arith.constant 0 : index
    %c0_13 = arith.constant 0 : index
    %17 = vector.load %arg6[%c0_12, %c0_13] : memref<256x128xbf16, #tpu.memory_space<vmem>>, vector<256x128xbf16>
    %cst_14 = arith.constant dense<0.000000e+00> : vector<16x128xf32>
    %18 = tpu.matmul %16, %17, %cst_14 {dimension_numbers = #tpu.dot_dimension_numbers<[1], [0], [0], [1], [0, 0, 1, 1], [], []>} : vector<16x256xbf16>, vector<256x128xbf16>, vector<16x128xf32> -> vector<16x128xf32>
    %19 = arith.truncf %18 : vector<16x128xf32> to vector<16x128xbf16>
    %c0_15 = arith.constant 0 : index
    %c0_16 = arith.constant 0 : index
    %20 = vector.load %arg7[%c0_15, %c0_16] : memref<1x128xbf16, #tpu.memory_space<vmem>>, vector<1x128xbf16>
    %21 = vector.broadcast %20 : vector<1x128xbf16> to vector<16x128xbf16>
    %22 = arith.addf %19, %21 : vector<16x128xbf16>
    %cst_17 = arith.constant 0.000000e+00 : bf16
    %23 = vector.broadcast %cst_17 : bf16 to vector<16x128xbf16>
    %24 = arith.maximumf %22, %23 : vector<16x128xbf16>
    %c0_18 = arith.constant 0 : index
    %c0_19 = arith.constant 0 : index
    %25 = vector.load %arg8[%c0_18, %c0_19] : memref<128x128xbf16, #tpu.memory_space<vmem>>, vector<128x128xbf16>
    %cst_20 = arith.constant dense<0.000000e+00> : vector<16x128xf32>
    %26 = tpu.matmul %24, %25, %cst_20 {dimension_numbers = #tpu.dot_dimension_numbers<[1], [0], [0], [1], [0, 0, 1, 1], [], []>} : vector<16x128xbf16>, vector<128x128xbf16>, vector<16x128xf32> -> vector<16x128xf32>
    %27 = arith.truncf %26 : vector<16x128xf32> to vector<16x128xbf16>
    %c0_21 = arith.constant 0 : index
    %c0_22 = arith.constant 0 : index
    %28 = vector.load %arg9[%c0_21, %c0_22] : memref<1x128xbf16, #tpu.memory_space<vmem>>, vector<1x128xbf16>
    %29 = vector.broadcast %28 : vector<1x128xbf16> to vector<16x128xbf16>
    %30 = arith.addf %27, %29 : vector<16x128xbf16>
    %cst_23 = arith.constant 0.000000e+00 : bf16
    %31 = vector.broadcast %cst_23 : bf16 to vector<16x128xbf16>
    %32 = arith.maximumf %30, %31 : vector<16x128xbf16>
    %c0_24 = arith.constant 0 : index
    %c0_25 = arith.constant 0 : index
    %33 = vector.load %arg10[%c0_24, %c0_25] : memref<128x128xbf16, #tpu.memory_space<vmem>>, vector<128x128xbf16>
    %cst_26 = arith.constant dense<0.000000e+00> : vector<16x128xf32>
    %34 = tpu.matmul %32, %33, %cst_26 {dimension_numbers = #tpu.dot_dimension_numbers<[1], [0], [0], [1], [0, 0, 1, 1], [], []>} : vector<16x128xbf16>, vector<128x128xbf16>, vector<16x128xf32> -> vector<16x128xf32>
    %c0_27 = arith.constant 0 : index
    %c0_28 = arith.constant 0 : index
    %35 = vector.load %arg11[%c0_27, %c0_28] : memref<1x128xf32, #tpu.memory_space<vmem>>, vector<1x128xf32>
    %36 = vector.broadcast %35 : vector<1x128xf32> to vector<16x128xf32>
    %37 = arith.addf %34, %36 : vector<16x128xf32>
    %c0_29 = arith.constant 0 : index
    %c0_30 = arith.constant 0 : index
    %38 = vector.load %arg12[%c0_29, %c0_30] : memref<16x128xf32, #tpu.memory_space<vmem>>, vector<16x128xf32>
    tpu.vector_store %arg12[%c0_29, %c0_30], %37 {strides = array<i32>} : memref<16x128xf32, #tpu.memory_space<vmem>>, vector<16x128xf32>,
    return
  }
  func.func @transform_0(%arg0: i32) -> (i32, i32) {
    %c0_i32 = arith.constant 0 : i32
    %c0_i32_0 = arith.constant 0 : i32
    return %arg0, %c0_i32 : i32, i32
  }
  func.func @transform_1(%arg0: i32) -> (i32, i32) {
    %c0_i32 = arith.constant 0 : i32
    %c0_i32_0 = arith.constant 0 : i32
    %c0_i32_1 = arith.constant 0 : i32
    return %c0_i32, %c0_i32_0 : i32, i32
  }
  func.func @transform_2(%arg0: i32) -> (i32, i32) {
    %c0_i32 = arith.constant 0 : i32
    %c0_i32_0 = arith.constant 0 : i32
    %c0_i32_1 = arith.constant 0 : i32
    return %c0_i32, %c0_i32_0 : i32, i32
  }
  func.func @transform_3(%arg0: i32) -> (i32, i32) {
    %c0_i32 = arith.constant 0 : i32
    %c0_i32_0 = arith.constant 0 : i32
    %c0_i32_1 = arith.constant 0 : i32
    return %c0_i32, %c0_i32_0 : i32, i32
  }
  func.func @transform_4(%arg0: i32) -> (i32, i32) {
    %c0_i32 = arith.constant 0 : i32
    %c0_i32_0 = arith.constant 0 : i32
    %c0_i32_1 = arith.constant 0 : i32
    return %c0_i32, %c0_i32_0 : i32, i32
  }
  func.func @transform_5(%arg0: i32) -> (i32, i32) {
    %c0_i32 = arith.constant 0 : i32
    %c0_i32_0 = arith.constant 0 : i32
    %c0_i32_1 = arith.constant 0 : i32
    return %c0_i32, %c0_i32_0 : i32, i32
  }
  func.func @transform_6(%arg0: i32) -> (i32, i32) {
    %c0_i32 = arith.constant 0 : i32
    %c0_i32_0 = arith.constant 0 : i32
    %c0_i32_1 = arith.constant 0 : i32
    return %c0_i32, %c0_i32_0 : i32, i32
  }
  func.func @transform_7(%arg0: i32) -> (i32, i32) {
    %c0_i32 = arith.constant 0 : i32
    %c0_i32_0 = arith.constant 0 : i32
    %c0_i32_1 = arith.constant 0 : i32
    return %c0_i32, %c0_i32_0 : i32, i32
  }
  func.func @transform_8(%arg0: i32) -> (i32, i32) {
    %c0_i32 = arith.constant 0 : i32
    %c0_i32_0 = arith.constant 0 : i32
    %c0_i32_1 = arith.constant 0 : i32
    return %c0_i32, %c0_i32_0 : i32, i32
  }
  func.func @transform_9(%arg0: i32) -> (i32, i32) {
    %c0_i32 = arith.constant 0 : i32
    %c0_i32_0 = arith.constant 0 : i32
    %c0_i32_1 = arith.constant 0 : i32
    return %c0_i32, %c0_i32_0 : i32, i32
  }
  func.func @transform_10(%arg0: i32) -> (i32, i32) {
    %c0_i32 = arith.constant 0 : i32
    %c0_i32_0 = arith.constant 0 : i32
    %c0_i32_1 = arith.constant 0 : i32
    return %c0_i32, %c0_i32_0 : i32, i32
  }
  func.func @transform_11(%arg0: i32) -> (i32, i32) {
    %c0_i32 = arith.constant 0 : i32
    %c0_i32_0 = arith.constant 0 : i32
    return %arg0, %c0_i32 : i32, i32
  }
}

</mosaic_0001>

<bundles_post_ra>
// kernel: tpu_custom_call.1
= control target key start
LH: loop header
LB: loop body
LE: loop exit
PB: predicated region body
PF: predicated region fallthrough
CT: control target
= control target key end

     0   :  { %16 = vsyncpa [#allocation3], 0  ;;  %s1985_s0 = inlined_call_operand.hbm [shape: bf16[16,32], index: 0, kind: input, shape index: {}]   ;;  %s1986_s1 = inlined_call_operand.hbm [shape: bf16[32,512], index: 1, kind: input, shape index: {}]   ;;  %s1987_s2 = inlined_call_operand.hbm [shape: bf16[1,512], index: 2, kind: input, shape index: {}]   ;;  %s1988_s3 = inlined_call_operand.hbm [shape: bf16[512,256], index: 3, kind: input, shape index: {}]   ;;  %s1989_s4 = inlined_call_operand.vmem [shape: bf16[1,256], index: 4, kind: input, shape index: {}]   ;;  %s1990_s5 = inlined_call_operand.hbm [shape: bf16[256,128], index: 5, kind: input, shape index: {}]   ;;  %s1991_s6 = inlined_call_operand.vmem [shape: bf16[1,128], index: 6, kind: input, shape index: {}]   ;;  %s1992_s7 = inlined_call_operand.hbm [shape: bf16[128,128], index: 7, kind: input, shape index: {}]   ;;  %s1993_s8 = inlined_call_operand.vmem [shape: bf16[1,128], index: 8, kind: input, shape index: {}]   ;;  %s1994_s9 = inlined_call_operand.hbm [shape: bf16[128,128], index: 9, kind: input, shape index: {}]   ;;  %s1995_s10 = inlined_call_operand.vmem [shape: f32[1,128], index: 10, kind: input, shape index: {}]   ;;  %s1996_s11 = inlined_call_operand.hbm [shape: f32[16,128], index: 11, kind: output, shape index: {}]  }
   0x1   :  { %17 = vsyncpa [#allocation6], 0 }
   0x2   :  { %18 = vsyncpa [#allocation9], 0 }
   0x3   :  { %19 = vsyncpa [#allocation12], 0 }
   0x4   :  { %20 = vsyncpa [#allocation4], 0  ;;  %s1807_s17 = smov [#allocation5]  }
   0x5   :  { %s38_s18 = sshll.u32 %s1807_s17, 4  ;;  %s39_s18 = int_to_ptr.vmem [resolvable:$true] %s38_s18 }
   0x6   :  { %s1645_s19 = scalar_lea.vmem %s39_s18, 1024  ;;  %p1650_p1 = scmp.lt.s32.totalorder %s39_s18, %s39_s18 }
   0x7   :  { %p1646_p0 = scmp.ne.s32.totalorder %s39_s18, %s1645_s19  ;;  %p1651_p2 = scmp.lt.s32.totalorder %s1645_s19, %s1645_s19 }
   0x9   :  { %p1652_p3 = por %p1651_p2, %p1650_p1 }
   0xb   :  { %p1653_p4 = pnand %p1652_p3, %p1646_p0 }
   0xd   :  { %1656 = shalt.err (!%p1653_p4)
}
   0xe   :  { %s1808_s20 = smov 256   ;;  %s1809_s21 = smov 16  }
   0xf   :  { %44 = dma.hbm_to_vmem [thread:$0]  %s1986_s1, 1024, %s39_s18, [#allocation6], %s1808_s20, %s1808_s20, %s1809_s21  }
  0x10   :  { %s1810_s24 = smov [#allocation8]  }
  0x11   :  { %s60_s25 = sshll.u32 %s1810_s24, 4  ;;  %s61_s25 = int_to_ptr.vmem [resolvable:$true] %s60_s25 }
  0x12   :  { %s1665_s26 = scalar_lea.vmem %s61_s25, 8192  ;;  %p1670_p6 = scmp.lt.s32.totalorder %s61_s25, %s61_s25 }
  0x13   :  { %p1666_p5 = scmp.ne.s32.totalorder %s61_s25, %s1665_s26  ;;  %p1671_p7 = scmp.lt.s32.totalorder %s1665_s26, %s1665_s26 }
  0x15   :  { %p1672_p8 = por %p1671_p7, %p1670_p6 }
  0x17   :  { %p1673_p9 = pnand %p1672_p8, %p1666_p5 }
  0x19   :  { %1676 = shalt.err (!%p1673_p9)
}
  0x1a   :  { %s1811_s27 = smov 128   ;;  %s1812_s28 = smov 8  }
  0x1b   :  { %66 = dma.hbm_to_vmem [thread:$0]  %s1988_s3, 8192, %s61_s25, [#allocation9], %s1811_s27, %s1811_s27, %s1812_s28  }
  0x1c   :  { %s1813_s1 = smov [#allocation11]   ;;  %s1814_s13 = smov [#allocation2]  }
  0x1d   :  { %s88_s12 = sshll.u32 %s1813_s1, 4  ;;  %s26_s14 = sshll.u32 %s1814_s13, 4  ;;  %s89_s12 = int_to_ptr.vmem [resolvable:$true] %s88_s12  ;;  %s27_s14 = int_to_ptr.vmem [resolvable:$true] %s26_s14 }
  0x1e   :  { %s1685_s15 = scalar_lea.vmem %s89_s12, 1024  ;;  %p1690_p11 = scmp.lt.s32.totalorder %s89_s12, %s89_s12 }
  0x1f   :  { %p1686_p10 = scmp.ne.s32.totalorder %s89_s12, %s1685_s15  ;;  %p1691_p12 = scmp.lt.s32.totalorder %s1685_s15, %s1685_s15 }
  0x21   :  { %p1692_p13 = por %p1691_p12, %p1690_p11 }
  0x23   :  { %p1693_p0 = pnand %p1692_p13, %p1686_p10 }
  0x25   :  { %1696 = shalt.err (!%p1693_p0)
}
  0x26   :  { %s1815_s16 = smov 64   ;;  %s1816_s17 = smov 4  }
  0x27   :  { %94 = dma.hbm_to_vmem [thread:$0]  %s1992_s7, 1024, %s89_s12, [#allocation12], %s1815_s16, %s1815_s16, %s1816_s17  }
  0x28   :  { %s1705_s19 = scalar_lea.vmem %s27_s14, 128  ;;  %p1710_p2 = scmp.lt.s32.totalorder %s27_s14, %s27_s14 }
  0x29   :  { %p1706_p1 = scmp.ne.s32.totalorder %s27_s14, %s1705_s19  ;;  %p1711_p3 = scmp.lt.s32.totalorder %s1705_s19, %s1705_s19 }
  0x2b   :  { %p1712_p4 = por %p1711_p3, %p1710_p2 }
  0x2d   :  { %p1713_p5 = pnand %p1712_p4, %p1706_p1 }
  0x2f   :  { %1716 = shalt.err (!%p1713_p5)
}
  0x30   :  { %32 = dma.hbm_to_vmem [thread:$0]  %s1985_s0, 128, %s27_s14, [#allocation3], %s1815_s16, %s1815_s16, %s1816_s17  }
  0x31   :  { %s1817_s22 = smov [#allocation7]   ;;  %s1818_s24 = smov [#allocation10]  }
  0x32   :  { %s51_s23 = sshll.u32 %s1817_s22, 4  ;;  %s74_s25 = sshll.u32 %s1818_s24, 4  ;;  %s52_s23 = int_to_ptr.vmem [resolvable:$true] %s51_s23  ;;  %s75_s25 = int_to_ptr.vmem [resolvable:$true] %s74_s25 }
  0x33   :  { %s1725_s7 = scalar_lea.vmem %s52_s23, 64  ;;  %p1730_p7 = scmp.lt.s32.totalorder %s52_s23, %s52_s23 }
  0x34   :  { %p1726_p6 = scmp.ne.s32.totalorder %s52_s23, %s1725_s7  ;;  %p1731_p8 = scmp.lt.s32.totalorder %s1725_s7, %s1725_s7 }
  0x36   :  { %p1732_p9 = por %p1731_p8, %p1730_p7 }
  0x38   :  { %p1733_p10 = pnand %p1732_p9, %p1726_p6 }
  0x3a   :  { %1736 = shalt.err (!%p1733_p10)
}
  0x3b   :  { %54 = dma.hbm_to_vmem [thread:$0]  %s1987_s2, 64, %s52_s23, [#allocation6]  }
  0x3c   :  { %s1745_s30 = scalar_lea.vmem %s75_s25, 2048  ;;  %p1750_p12 = scmp.lt.s32.totalorder %s75_s25, %s75_s25 }
  0x3d   :  { %p1746_p11 = scmp.ne.s32.totalorder %s75_s25, %s1745_s30  ;;  %p1751_p13 = scmp.lt.s32.totalorder %s1745_s30, %s1745_s30 }
  0x3f   :  { %p1752_p0 = por %p1751_p13, %p1750_p12 }
  0x41   :  { %p1753_p1 = pnand %p1752_p0, %p1746_p11 }
  0x43   :  { %1756 = shalt.err (!%p1753_p1)
}
  0x44   :  { %80 = dma.hbm_to_vmem [thread:$0]  %s1990_s5, 2048, %s75_s25, [#allocation9], %s1815_s16, %s1815_s16, %s1816_s17  }
  0x45   :  { %s1819_s12 = smov [#allocation13]  }
  0x46   :  { %s102_s13 = sshll.u32 %s1819_s12, 4  ;;  %s103_s13 = int_to_ptr.vmem [resolvable:$true] %s102_s13 }
  0x47   :  { %s1765_s14 = scalar_lea.vmem %s103_s13, 1024  ;;  %p1770_p3 = scmp.lt.s32.totalorder %s103_s13, %s103_s13 }
  0x48   :  { %p1766_p2 = scmp.ne.s32.totalorder %s103_s13, %s1765_s14  ;;  %p1771_p4 = scmp.lt.s32.totalorder %s1765_s14, %s1765_s14 }
  0x4a   :  { %p1772_p5 = por %p1771_p4, %p1770_p3 }
  0x4c   :  { %p1773_p6 = pnand %p1772_p5, %p1766_p2 }
  0x4e   :  { %1776 = shalt.err (!%p1773_p6)
}
  0x4f   :  { %108 = dma.hbm_to_vmem [thread:$0]  %s1994_s9, 1024, %s103_s13, [#allocation12], %s1815_s16, %s1815_s16, %s1816_s17  }
  0x50   :  { %1797 = dma.done.wait [#allocation3], 128  }
  0x51   :  { %1798 = vsyncadd [#allocation3], 4294967168 }
  0x52   :  { %1799 = dma.done.wait [#allocation6], 1088  }
  0x53   :  { %1800 = vsyncadd [#allocation6], 4294966208 }
  0x54   :  { %1801 = dma.done.wait [#allocation9], 10240  }
  0x55   :  { %1802 = vsyncadd [#allocation9], 4294957056 }
  0x56   :  { %1803 = dma.done.wait [#allocation12], 2048  }
  0x57   :  { %1804 = vsyncadd [#allocation12], 4294965248  ;;  %v1820_v0 = vmov 0   ;;  %v1496_v1 = vld [vmem:[#allocation5 + $0x24] ss:$16 sps:$4 sm:$0xff]   ;;  %v1502_v6 = vld [vmem:[#allocation2] sm:$0xff]  }
  0x58   :  { %224 = vmatprep.mubr.bf16.mxu1 %v1820_v0  ;;  %v1498_v2 = vld [vmem:[#allocation5 + $0x20] ss:$16 sps:$4 sm:$0xff]   ;;  %204 = vmatprep.subr.bf16.mxu1 %v1496_v1  ;;  %v1499_v3 = vld [vmem:[#allocation5 + $0x4] ss:$16 sps:$4 sm:$0xff]   ;;  %v1505_v5 = vld [vmem:[#allocation5 + $0x2c] ss:$16 sps:$4 sm:$0xff]  }
  0x59   :  { %205 = vmatpush1.bf16.msra.mxu1 %v1498_v2  ;;  %v1501_v4 = vld [vmem:[#allocation5] ss:$16 sps:$4 sm:$0xff]   ;;  %v1503_v7 = vld [vmem:[#allocation5 + $0x28] ss:$16 sps:$4 sm:$0xff]   ;;  %vm188_vm0 = vcmask 261120   ;;  %vm1823_vm1 = vmmov 0  }
  0x5a   :  { %206 = vmatprep.subr.bf16.mxu1 %v1499_v3  ;;  %v1509_v8 = vld [vmem:[#allocation8 + $0x74] ss:$8 sps:$4 sm:$0xff]   ;;  %v1511_v9 = vld [vmem:[#allocation8 + $0x70] ss:$8 sps:$4 sm:$0xff]   ;;  %v1512_v11 = vld [vmem:[#allocation8 + $0x64] ss:$8 sps:$4 sm:$0xff]  }
  0x5b   :  { %v1508_v10 = vld [vmem:[#allocation5 + $0xc] ss:$16 sps:$4 sm:$0xff]   ;;  %728 = vmatprep.subr.bf16.mxu0 %v1509_v8  ;;  %v1506_v13 = vld [vmem:[#allocation5 + $0x8] ss:$16 sps:$4 sm:$0xff]  }
  0x5c   :  { %729 = vmatpush1.bf16.msra.mxu0 %v1511_v9  ;;  %v1514_v12 = vld [vmem:[#allocation8 + $0x60] ss:$8 sps:$4 sm:$0xff]   ;;  %v1515_v14 = vld [vmem:[#allocation8 + $0x54] ss:$8 sps:$4 sm:$0xff]   ;;  %v1517_v16 = vld [vmem:[#allocation8 + $0x170] ss:$8 sps:$4 sm:$0xff]  }
  0x5d   :  { %207 = vmatpush1.bf16.msra.mxu1 %v1501_v4  ;;  %730 = vmatprep.subr.bf16.mxu0 %v1512_v11  ;;  %v1519_v15 = vld [vmem:[#allocation8 + $0x174] ss:$8 sps:$4 sm:$0xff]   ;;  %v1520_v17 = vld [vmem:[#allocation8 + $0x50] ss:$8 sps:$4 sm:$0xff]   ;;  %v1521_v18 = vld [vmem:[#allocation8 + $0x44] ss:$8 sps:$4 sm:$0xff]  }
  0x5e   :  { %247 = vmatprep.subr.bf16.mxu1 %v1505_v5  ;;  %v1525_v19 = vld [vmem:[#allocation8 + $0x164] ss:$8 sps:$4 sm:$0xff]   ;;  %v1526_v20 = vld [vmem:[#allocation8 + $0x40] ss:$8 sps:$4 sm:$0xff]   ;;  %v1527_v22 = vld [vmem:[#allocation8 + $0x34] ss:$8 sps:$4 sm:$0xff]  }
  0x5f   :  { %v1523_v21 = vld [vmem:[#allocation8 + $0x160] ss:$8 sps:$4 sm:$0xff]   ;;  %v1531_v23 = vld [vmem:[#allocation8 + $0x154] ss:$8 sps:$4 sm:$0xff]   ;;  %v1529_v24 = vld [vmem:[#allocation8 + $0x150] ss:$8 sps:$4 sm:$0xff]  }
  0x60   :  { %1297 = vmatmul.mubr.msk.bf16.vlgmr.msra.gmra.mxu1 %vm188_vm0, %v1502_v6  ;;  %731 = vmatpush1.bf16.msra.mxu0 %v1514_v12  ;;  %v1532_v25 = vld [vmem:[#allocation8 + $0x30] ss:$8 sps:$4 sm:$0xff]   ;;  %v1533_v26 = vld [vmem:[#allocation8 + $0x24] ss:$8 sps:$4 sm:$0xff]   ;;  %v1538_v28 = vld [vmem:[#allocation8 + $0x20] ss:$8 sps:$4 sm:$0xff]  }
  0x61   :  { %248 = vmatpush1.bf16.msra.mxu1 %v1503_v7  ;;  %267 = vmatprep.mubr.bf16.mxu1 %v1820_v0  ;;  %v1537_v27 = vld [vmem:[#allocation8 + $0x144] ss:$8 sps:$4 sm:$0xff]   ;;  %v1535_v29 = vld [vmem:[#allocation8 + $0x140] ss:$8 sps:$4 sm:$0xff]   ;;  %v1539_v30 = vld [vmem:[#allocation8 + $0x14] ss:$8 sps:$4 sm:$0xff]  }
  0x62   :  { %249 = vmatprep.subr.bf16.mxu1 %v1508_v10  ;;  %732 = vmatprep.subr.bf16.mxu0 %v1515_v14  ;;  %v1543_v31 = vld [vmem:[#allocation8 + $0x134] ss:$8 sps:$4 sm:$0xff]   ;;  %v1541_v32 = vld [vmem:[#allocation8 + $0x130] ss:$8 sps:$4 sm:$0xff]   ;;  %v1545_v34 = vld [vmem:[#allocation8 + $0x4] ss:$8 sps:$4 sm:$0xff]   ;;  %v295_v14 = vlaneseq }
  0x63   :  { %v1544_v33 = vld [vmem:[#allocation8 + $0x10] ss:$8 sps:$4 sm:$0xff]   ;;  %v1549_v35 = vld [vmem:[#allocation8 + $0x124] ss:$8 sps:$4 sm:$0xff]   ;;  %v1550_v36 = vld [vmem:[#allocation8] ss:$8 sps:$4 sm:$0xff]  }
  0x64   :  { %733 = vmatpush1.bf16.msra.mxu0 %v1520_v17  ;;  %v1547_v37 = vld [vmem:[#allocation8 + $0x120] ss:$8 sps:$4 sm:$0xff]   ;;  %v1551_v38 = vld [vmem:[#allocation8 + $0xf4] ss:$8 sps:$4 sm:$0xff]   ;;  %v1553_v40 = vld [vmem:[#allocation8 + $0x110] ss:$8 sps:$4 sm:$0xff]  }
  0x65   :  { %250 = vmatpush1.bf16.msra.mxu1 %v1506_v13  ;;  %734 = vmatprep.subr.bf16.mxu0 %v1521_v18  ;;  %v1555_v39 = vld [vmem:[#allocation8 + $0x114] ss:$8 sps:$4 sm:$0xff]   ;;  %v1556_v41 = vld [vmem:[#allocation8 + $0xf0] ss:$8 sps:$4 sm:$0xff]   ;;  %v1557_v42 = vld [vmem:[#allocation8 + $0xe4] ss:$8 sps:$4 sm:$0xff]  }
  0x66   :  { %771 = vmatprep.subr.bf16.mxu1 %v1519_v15  ;;  %v1561_v43 = vld [vmem:[#allocation8 + $0x104] ss:$8 sps:$4 sm:$0xff]   ;;  %v1562_v44 = vld [vmem:[#allocation8 + $0xe0] ss:$8 sps:$4 sm:$0xff]   ;;  %v1563_v46 = vld [vmem:[#allocation8 + $0xd4] ss:$8 sps:$4 sm:$0xff]  }
  0x67   :  { %v1559_v45 = vld [vmem:[#allocation8 + $0x100] ss:$8 sps:$4 sm:$0xff]   ;;  %v1567_v47 = vld [vmem:[#allocation8 + $0x1f4] ss:$8 sps:$4 sm:$0xff]   ;;  %v1568_v48 = vld [vmem:[#allocation8 + $0xd0] ss:$8 sps:$4 sm:$0xff]  }
  0x68   :  { %1298 = vmatmul.mubr.msk.bf16.vlgmr.msra.gmra.mxu1 %vm188_vm0, %v1502_v6  ;;  %735 = vmatpush1.bf16.msra.mxu0 %v1526_v20  ;;  %v1565_v49 = vld [vmem:[#allocation8 + $0x1f0] ss:$8 sps:$4 sm:$0xff]   ;;  %v1569_v50 = vld [vmem:[#allocation8 + $0xc4] ss:$8 sps:$4 sm:$0xff]   ;;  %v1574_v52 = vld [vmem:[#allocation8 + $0xc0] ss:$8 sps:$4 sm:$0xff]  }
  0x69   :  { %772 = vmatpush1.bf16.msra.mxu1 %v1517_v16  ;;  %736 = vmatprep.subr.bf16.mxu0 %v1527_v22  ;;  %v1573_v51 = vld [vmem:[#allocation8 + $0x1e4] ss:$8 sps:$4 sm:$0xff]   ;;  %v1571_v53 = vld [vmem:[#allocation8 + $0x1e0] ss:$8 sps:$4 sm:$0xff]   ;;  %v1575_v54 = vld [vmem:[#allocation8 + $0xb4] ss:$8 sps:$4 sm:$0xff]  }
  0x6a   :  { %773 = vmatprep.subr.bf16.mxu1 %v1525_v19  ;;  %v1579_v55 = vld [vmem:[#allocation8 + $0x1d4] ss:$8 sps:$4 sm:$0xff]   ;;  %v1580_v56 = vld [vmem:[#allocation8 + $0xb0] ss:$8 sps:$4 sm:$0xff]   ;;  %v1581_v58 = vld [vmem:[#allocation8 + $0xa4] ss:$8 sps:$4 sm:$0xff]  }
  0x6b   :  { %v1577_v57 = vld [vmem:[#allocation8 + $0x1d0] ss:$8 sps:$4 sm:$0xff]   ;;  %v1585_v59 = vld [vmem:[#allocation8 + $0x1c4] ss:$8 sps:$4 sm:$0xff]   ;;  %v1583_v60 = vld [vmem:[#allocation8 + $0x1c0] ss:$8 sps:$4 sm:$0xff]  }
  0x6c   :  { %737 = vmatpush1.bf16.msra.mxu0 %v1532_v25  ;;  %v1586_v61 = vld [vmem:[#allocation8 + $0xa0] ss:$8 sps:$4 sm:$0xff]   ;;  %v1587_v62 = vld [vmem:[#allocation8 + $0x94] ss:$8 sps:$4 sm:$0xff]   ;;  %v1589_v1 = vld [vmem:[#allocation8 + $0x1b0] ss:$8 sps:$4 sm:$0xff]  }
  0x6d   :  { %774 = vmatpush1.bf16.msra.mxu1 %v1523_v21  ;;  %738 = vmatprep.subr.bf16.mxu0 %v1533_v26  ;;  %v1591_v63 = vld [vmem:[#allocation8 + $0x1b4] ss:$8 sps:$4 sm:$0xff]   ;;  %v1592_v2 = vld [vmem:[#allocation8 + $0x90] ss:$8 sps:$4 sm:$0xff]   ;;  %v1593_v3 = vld [vmem:[#allocation8 + $0x84] ss:$8 sps:$4 sm:$0xff]  }
  0x6e   :  { %775 = vmatprep.subr.bf16.mxu1 %v1531_v23  ;;  %v1597_v4 = vld [vmem:[#allocation8 + $0x1a4] ss:$8 sps:$4 sm:$0xff]   ;;  %v1595_v5 = vld [vmem:[#allocation8 + $0x1a0] ss:$8 sps:$4 sm:$0xff]   ;;  %v1601_v7 = vld [vmem:[#allocation8 + $0x194] ss:$8 sps:$4 sm:$0xff]  }
  0x6f   :  { %v1598_v6 = vld [vmem:[#allocation8 + $0x80] ss:$8 sps:$4 sm:$0xff]   ;;  %v1599_v8 = vld [vmem:[#allocation8 + $0x190] ss:$8 sps:$4 sm:$0xff]   ;;  %v1604_v9 = vld [vmem:[#allocation8 + $0x184] ss:$8 sps:$4 sm:$0xff]  }
  0x70   :  { %739 = vmatpush1.bf16.msra.mxu0 %v1538_v28  ;;  %v1602_v10 = vld [vmem:[#allocation8 + $0x180] ss:$8 sps:$4 sm:$0xff]   ;;  %v1605_v11 = vld [vmem:[#allocation10 + $0x78] sm:$0xff]   ;;  %v1821_v12 = vmov 1966171168   ;;  %v296_v16 = vshrl.u32 %v295_v14, 7 }
  0x71   :  { %776 = vmatpush1.bf16.msra.mxu1 %v1529_v24  ;;  %740 = vmatprep.subr.bf16.mxu0 %v1539_v30  ;;  %v293_v13 = vunpack.c.l.s4 %v1821_v12  ;;  %v1299_v17 = vld.sshfl [vmem:[#allocation7] sm:$0x33 pattern:$0x75316420] }
  0x72   :  { %777 = vmatprep.subr.bf16.mxu1 %v1537_v27  ;;  %v291_v19 = vcombine.high %v1299_v17, %v1299_v17  ;;  %v1929_v24 = vsub.s32 0, %v296_v16 }
  0x73   :  { %v294_v15 = vunpack.c.0.s8 %v293_v13 }
  0x74   :  { %741 = vmatpush1.bf16.msra.mxu0 %v1544_v33 }
  0x75   :  { %778 = vmatpush1.bf16.msra.mxu1 %v1535_v29  ;;  %742 = vmatprep.subr.bf16.mxu0 %v1545_v34  ;;  %v1925_v18 = vsub.s32 %v294_v15, %v296_v16 }
  0x76   :  { %779 = vmatprep.subr.bf16.mxu1 %v1543_v31 }
  0x77   :  { %v298_v20 = vrot.slane %v1299_v17, %v1925_v18  ;;  %v305_v21 = vrot.slane %v291_v19, %v1925_v18 }
  0x78   :  { %743 = vmatpush1.bf16.msra.mxu0 %v1550_v36 }
  0x79   :  { %780 = vmatpush1.bf16.msra.mxu1 %v1541_v32  ;;  %744 = vmatprep.subr.bf16.mxu0 %v1551_v38  ;;  %v309_v23 = vpack.i.b16 %v298_v20, %v298_v20  ;;  %v316_v25 = vpack.i.b16 %v305_v21, %v305_v21  ;;  %v306_v29 = vcombine.high %v298_v20, %v298_v20 }
  0x7a   :  { %781 = vmatprep.subr.bf16.mxu1 %v1549_v35  ;;  %v307_v32 = vcombine.high %v305_v21, %v305_v21 }
  0x7b   :  { %v314_v28 = vrot.slane %v309_v23, %v1929_v24  ;;  %v321_v31 = vrot.slane %v316_v25, %v1929_v24 }
  0x7c   :  { %745 = vmatpush2.bf16.msra.mxu0 %v1556_v41 }
  0x7d   :  { %782 = vmatpush1.bf16.msra.mxu1 %v1547_v37  ;;  %746 = vmatprep.subr.bf16.mxu0 %v1557_v42  ;;  %v323_v37 = vpack.i.b16 %v306_v29, %v306_v29  ;;  %v1606_v42 = vld [vmem:[#allocation10 + $0x38] sm:$0xff]  }
  0x7e   :  { %783 = vmatprep.subr.bf16.mxu1 %v1555_v39  ;;  %v330_v39 = vpack.i.b16 %v307_v32, %v307_v32 }
  0x80   :  { %747 = vmatpush2.bf16.msra.mxu0 %v1562_v44  ;;  %v328_v44 = vrot.slane %v323_v37, %v1929_v24  ;;  %v1625_v37 = vld [vmem:[#allocation11 + $0x18] sm:$0xff]  }
  0x81   :  { %784 = vmatpush1.bf16.msra.mxu1 %v1553_v40  ;;  %748 = vmatprep.subr.bf16.mxu0 %v1563_v46  ;;  %v1607_v46 = vld [vmem:[#allocation10 + $0x70] sm:$0xff]  }
  0x82   :  { %785 = vmatprep.subr.bf16.mxu1 %v1561_v43 }
  0x84   :  { %749 = vmatpush2.bf16.msra.mxu0 %v1568_v48  ;;  %v335_v48 = vrot.slane %v330_v39, %v1929_v24  ;;  %v1627_v39 = vld [vmem:[#allocation11 + $0x8] sm:$0xff]  }
  0x85   :  { %786 = vmatpush1.bf16.msra.mxu1 %v1559_v45  ;;  %750 = vmatprep.subr.bf16.mxu0 %v1569_v50 }
  0x86   :  { %787 = vmatprep.subr.bf16.mxu1 %v1567_v47 }
  0x88   :  { %751 = vmatpush2.bf16.msra.mxu0 %v1574_v52 }
  0x89   :  { %788 = vmatpush2.bf16.msra.mxu1 %v1565_v49  ;;  %752 = vmatprep.subr.bf16.mxu0 %v1575_v54 }
  0x8a   :  { %789 = vmatprep.subr.bf16.mxu1 %v1573_v51  ;;  %v1608_v51 = vld [vmem:[#allocation10 + $0x30] sm:$0xff]  }
  0x8c   :  { %753 = vmatpush2.bf16.msra.mxu0 %v1580_v56  ;;  %v1609_v56 = vld [vmem:[#allocation10 + $0x68] sm:$0xff]  }
  0x8d   :  { %790 = vmatpush2.bf16.msra.mxu1 %v1571_v53  ;;  %754 = vmatprep.subr.bf16.mxu0 %v1581_v58  ;;  %v1611_v58 = vld [vmem:[#allocation10 + $0x60] sm:$0xff]  }
  0x8e   :  { %791 = vmatprep.subr.bf16.mxu1 %v1579_v55 }
  0x90   :  { %755 = vmatpush2.bf16.msra.mxu0 %v1586_v61  ;;  %v1614_v61 = vld [vmem:[#allocation10 + $0x18] sm:$0xff]  }
  0x91   :  { %792 = vmatpush2.bf16.msra.mxu1 %v1577_v57  ;;  %756 = vmatprep.subr.bf16.mxu0 %v1587_v62  ;;  %v1610_v57 = vld [vmem:[#allocation10 + $0x28] sm:$0xff]   ;;  %v1615_v62 = vld [vmem:[#allocation10 + $0x50] sm:$0xff]  }
  0x92   :  { %793 = vmatprep.subr.bf16.mxu1 %v1585_v59  ;;  %v1612_v59 = vld [vmem:[#allocation10 + $0x20] sm:$0xff]  }
  0x94   :  { %757 = vmatpush2.bf16.msra.mxu0 %v1592_v2  ;;  %v1618_v2 = vld [vmem:[#allocation10 + $0x8] sm:$0xff]  }
  0x95   :  { %794 = vmatpush2.bf16.msra.mxu1 %v1583_v60  ;;  %758 = vmatprep.subr.bf16.mxu0 %v1593_v3  ;;  %v1613_v60 = vld [vmem:[#allocation10 + $0x58] sm:$0xff]   ;;  %v1619_v3 = vld [vmem:[#allocation10 + $0x40] sm:$0xff]  }
  0x96   :  { %795 = vmatprep.subr.bf16.mxu1 %v1591_v63  ;;  %v1616_v63 = vld [vmem:[#allocation10 + $0x10] sm:$0xff]  }
  0x98   :  { %759 = vmatpush2.bf16.msra.mxu0 %v1598_v6  ;;  %v1822_v6 = vmov 0.0  }
  0x99   :  { %796 = vmatpush2.bf16.msra.mxu1 %v1589_v1  ;;  %1398 = vmatprep.subr.bf16.mxu0 %v1605_v11  ;;  %v1617_v1 = vld [vmem:[#allocation10 + $0x48] sm:$0xff]  }
  0x9a   :  { %797 = vmatprep.subr.bf16.mxu1 %v1597_v4  ;;  %v1620_v4 = vld [vmem:[#allocation10] sm:$0xff]  }
  0x9d   :  { %798 = vmatpush2.bf16.msra.mxu1 %v1595_v5  ;;  %v1621_v5 = vld [vmem:[#allocation11 + $0x38] sm:$0xff]  }
  0x9e   :  { %799 = vmatprep.subr.bf16.mxu1 %v1601_v7  ;;  %v1622_v7 = vld [vmem:[#allocation11 + $0x30] sm:$0xff]  }
  0xa1   :  { %800 = vmatpush2.bf16.msra.mxu1 %v1599_v8  ;;  %v1623_v8 = vld [vmem:[#allocation11 + $0x28] sm:$0xff]  }
  0xa2   :  { %801 = vmatprep.subr.bf16.mxu1 %v1604_v9  ;;  %v1624_v9 = vld [vmem:[#allocation11 + $0x20] sm:$0xff]  }
  0xa5   :  { %802 = vmatpush2.bf16.msra.mxu1 %v1602_v10  ;;  %v1364_v10 = vld.sshfl [vmem:[%s1989_s4] sm:$0x11 pattern:$0x75316420] }
  0xa6   :  { %1438 = vmatprep.subr.bf16.mxu1 %v1822_v6  ;;  %v825_v12 = vcombine.high %v1364_v10, %v1364_v10  ;;  %v832_v14 = vrot.slane %v1364_v10, %v1925_v18 }
  0xa8   :  { %v839_v15 = vrot.slane %v825_v12, %v1925_v18  ;;  %v841_v20 = vpack.i.b16 %v832_v14, %v832_v14 }
  0xaa   :  { %v848_v21 = vpack.i.b16 %v839_v15, %v839_v15 }
  0xac   :  { %v853_v32 = vrot.slane %v848_v21, %v1929_v24 }
 0x120   :  { %v226_v22 = vpop.f32.mrf.mxu1 }
 0x122   :  { %v228_v26 = vpop.f32.mrf.mxu1 }
 0x124   :  { %v230_v27 = vpop.f32.mrf.mxu1 }
 0x125   :  { %v278_v30 = vpack.c.bf16 %v230_v27, %v226_v22  ;;  %v846_v27 = vrot.slane %v841_v20, %v1929_v24 }
 0x126   :  { %v232_v33 = vpop.f32.mrf.mxu1 }
 0x127   :  { %v279_v34 = vpack.c.bf16 %v232_v33, %v228_v26  ;;  %v336_v35 = vadd.bf16 %v314_v28, %v278_v30 }
 0x128   :  { %v269_v36 = vpop.f32.mrf.mxu1 }
 0x129   :  { %v337_v38 = vadd.bf16 %v321_v31, %v279_v34  ;;  %v340_v45 = vmax.bf16 %v1820_v0, %v336_v35 }
 0x12a   :  { %v271_v40 = vpop.f32.mrf.mxu1 }
 0x12b   :  { %v341_v41 = vmax.bf16 %v1820_v0, %v337_v38  ;;  %v1626_v38 = vld [vmem:[#allocation11 + $0x10] sm:$0xff]  }
 0x12c   :  { %v273_v43 = vpop.f32.mrf.mxu1 }
 0x12d   :  { %v280_v47 = vpack.c.bf16 %v273_v43, %v269_v36  ;;  %760 = vmatprep.mubr.bf16.mxu0 %v341_v41  ;;  %v1629_v41 = vld [vmem:[#allocation13 + $0x38] sm:$0xff]   ;;  %v1631_v43 = vld [vmem:[#allocation13 + $0x28] sm:$0xff]  }
 0x12e   :  { %v275_v49 = vpop.f32.mrf.mxu1  ;;  %761 = vmatmul.mubr.bf16.vlgmr.msra.gmra.mxu0 %v340_v45  ;;  %v1633_v45 = vld [vmem:[#allocation13 + $0x18] sm:$0xff]  }
 0x12f   :  { %v281_v50 = vpack.c.bf16 %v275_v49, %v271_v40  ;;  %1399 = vmatpush3.bf16.msra.mxu0 %v1606_v42  ;;  %v338_v52 = vadd.bf16 %v328_v44, %v280_v47  ;;  %v1628_v40 = vld [vmem:[#allocation11] sm:$0xff]   ;;  %v1630_v42 = vld [vmem:[#allocation13 + $0x30] sm:$0xff]  }
 0x130   :  { %1400 = vmatprep.subr.bf16.mxu0 %v1607_v46  ;;  %v1632_v44 = vld [vmem:[#allocation13 + $0x20] sm:$0xff]   ;;  %v1028_v47 = vld [vmem:[%s1991_s6] sm:$0x1] }
 0x131   :  { %v339_v53 = vadd.bf16 %v335_v48, %v281_v50  ;;  %v342_v55 = vmax.bf16 %v1820_v0, %v338_v52  ;;  %v1030_v49 = vpack.i.b16 %v1028_v47, %v1028_v47 }
 0x133   :  { %v343_v54 = vmax.bf16 %v1820_v0, %v339_v53  ;;  %1401 = vmatpush3.bf16.msra.mxu0 %v1608_v51 }
 0x134   :  { %1402 = vmatprep.subr.bf16.mxu0 %v1609_v56 }
 0x135   :  { %803 = vmatprep.mubr.bf16.mxu1 %v343_v54  ;;  %v1035_v54 = vrot.slane %v1030_v49, %v1929_v24 }
 0x136   :  { %804 = vmatmul.mubr.bf16.vlgmr.msra.gmra.mxu1 %v342_v55 }
 0x137   :  { %1403 = vmatpush3.bf16.msra.mxu0 %v1610_v57  ;;  %1439 = vmatpush3.bf16.msra.mxu1 %v1621_v5 }
 0x138   :  { %1404 = vmatprep.subr.bf16.mxu0 %v1611_v58  ;;  %1440 = vmatprep.subr.bf16.mxu1 %v1822_v6  ;;  %v1634_v58 = vld [vmem:[#allocation13 + $0x10] sm:$0xff]  }
 0x139   :  { %1454 = vmatprep.mubr.msk.bf16.mxu1 %vm1823_vm1, %v1822_v6 }
 0x13b   :  { %1405 = vmatpush3.bf16.msra.mxu0 %v1612_v59  ;;  %1441 = vmatpush3.bf16.msra.mxu1 %v1622_v7  ;;  %v1635_v59 = vld [vmem:[#allocation13 + $0x8] sm:$0xff]  }
 0x13c   :  { %1406 = vmatprep.subr.bf16.mxu0 %v1613_v60  ;;  %1442 = vmatprep.subr.bf16.mxu1 %v1822_v6  ;;  %v1636_v60 = vld [vmem:[#allocation13] sm:$0xff]  }
 0x13f   :  { %1407 = vmatpush3.bf16.msra.mxu0 %v1614_v61  ;;  %1443 = vmatpush3.bf16.msra.mxu1 %v1623_v8  ;;  %v1144_v61 = vld [vmem:[%s1993_s8] sm:$0x1]  ;;  %s1824_s8 = smov [#allocation14]  }
 0x140   :  { %1408 = vmatprep.subr.bf16.mxu0 %v1615_v62  ;;  %1444 = vmatprep.subr.bf16.mxu1 %v1822_v6  ;;  %v1146_v62 = vpack.i.b16 %v1144_v61, %v1144_v61  ;;  %s1273_s19 = sshll.u32 %s1824_s8, 4  ;;  %s1274_s19 = int_to_ptr.vmem [resolvable:$true] %s1273_s19 }
 0x141   :  { %s1777_s20 = scalar_lea.vmem %s1274_s19, 256  ;;  %p1782_p8 = scmp.lt.s32.totalorder %s1274_s19, %s1274_s19 }
 0x142   :  { %p1778_p7 = scmp.ne.s32.totalorder %s1274_s19, %s1777_s20  ;;  %p1783_p9 = scmp.lt.s32.totalorder %s1777_s20, %s1777_s20 }
 0x143   :  { %1409 = vmatpush3.bf16.msra.mxu0 %v1616_v63  ;;  %1445 = vmatpush3.bf16.msra.mxu1 %v1624_v9 }
 0x144   :  { %1410 = vmatprep.subr.bf16.mxu0 %v1617_v1  ;;  %1446 = vmatprep.subr.bf16.mxu1 %v1822_v6  ;;  %p1784_p10 = por %p1783_p9, %p1782_p8 }
 0x146   :  { %p1785_p11 = pnand %p1784_p10, %p1778_p7 }
 0x147   :  { %1411 = vmatpush3.bf16.msra.mxu0 %v1618_v2  ;;  %1447 = vmatpush3.bf16.msra.mxu1 %v1625_v37  ;;  %v1151_v2 = vrot.slane %v1146_v62, %v1929_v24 }
 0x148   :  { %1412 = vmatprep.subr.bf16.mxu0 %v1619_v3  ;;  %1448 = vmatprep.subr.bf16.mxu1 %v1822_v6 }
 0x14b   :  { %1413 = vmatpush3.bf16.msra.mxu0 %v1620_v4  ;;  %1449 = vmatpush3.bf16.msra.mxu1 %v1626_v38 }
 0x14c   :  { %1458 = vmatprep.subr.bf16.mxu0 %v1822_v6  ;;  %1450 = vmatprep.subr.bf16.mxu1 %v1822_v6 }
 0x14f   :  { %1451 = vmatpush3.bf16.msra.mxu1 %v1627_v39 }
 0x150   :  { %1452 = vmatprep.subr.bf16.mxu1 %v1822_v6 }
 0x153   :  { %1453 = vmatpush3.bf16.msra.mxu1 %v1628_v40 }
 0x1ee   :  { %v762_v11 = vpop.f32.mrf.mxu0 }
 0x1f0   :  { %v764_v13 = vpop.f32.mrf.mxu0 }
 0x1f2   :  { %v766_v17 = vpop.f32.mrf.mxu0 }
 0x1f4   :  { %v768_v26 = vpop.f32.mrf.mxu0 }
 0x1f6   :  { %v805_v16 = vpop.f32.mrf.mxu1 }
 0x1f7   :  { %v806_v23 = vadd.f32 %v805_v16, %v762_v11 }
 0x1f8   :  { %v807_v19 = vpop.f32.mrf.mxu1 }
 0x1f9   :  { %v808_v29 = vadd.f32 %v807_v19, %v764_v13 }
 0x1fa   :  { %v809_v22 = vpop.f32.mrf.mxu1 }
 0x1fb   :  { %v810_v25 = vadd.f32 %v809_v22, %v766_v17 }
 0x1fc   :  { %v811_v28 = vpop.f32.mrf.mxu1 }
 0x1fd   :  { %v814_v30 = vpack.c.bf16 %v810_v25, %v806_v23  ;;  %v812_v31 = vadd.f32 %v811_v28, %v768_v26 }
 0x1ff   :  { %v815_v33 = vpack.c.bf16 %v812_v31, %v808_v29  ;;  %v854_v34 = vadd.bf16 %v846_v27, %v814_v30 }
 0x201   :  { %v855_v18 = vadd.bf16 %v853_v32, %v815_v33  ;;  %v856_v36 = vmax.bf16 %v1820_v0, %v854_v34 }
 0x203   :  { %v857_v35 = vmax.bf16 %v1820_v0, %v855_v18 }
 0x205   :  { %1018 = vmatprep.mubr.bf16.mxu0 %v857_v35 }
 0x206   :  { %1019 = vmatmul.mubr.bf16.vlgmr.msra.gmra.mxu0 %v856_v36 }
 0x207   :  { %1474 = vmatprep.mubr.msk.bf16.mxu0 %vm1823_vm1, %v1822_v6  ;;  %1459 = vmatpush3.bf16.msra.mxu0 %v1629_v41 }
 0x208   :  { %1460 = vmatprep.subr.bf16.mxu0 %v1822_v6 }
 0x20b   :  { %1461 = vmatpush3.bf16.msra.mxu0 %v1630_v42 }
 0x20c   :  { %1462 = vmatprep.subr.bf16.mxu0 %v1822_v6 }
 0x20f   :  { %1463 = vmatpush3.bf16.msra.mxu0 %v1631_v43 }
 0x210   :  { %1464 = vmatprep.subr.bf16.mxu0 %v1822_v6 }
 0x213   :  { %1465 = vmatpush3.bf16.msra.mxu0 %v1632_v44 }
 0x214   :  { %1466 = vmatprep.subr.bf16.mxu0 %v1822_v6 }
 0x217   :  { %1467 = vmatpush3.bf16.msra.mxu0 %v1633_v45 }
 0x218   :  { %1468 = vmatprep.subr.bf16.mxu0 %v1822_v6 }
 0x21b   :  { %1469 = vmatpush3.bf16.msra.mxu0 %v1634_v58 }
 0x21c   :  { %1470 = vmatprep.subr.bf16.mxu0 %v1822_v6 }
 0x21f   :  { %1471 = vmatpush3.bf16.msra.mxu0 %v1635_v59 }
 0x220   :  { %1472 = vmatprep.subr.bf16.mxu0 %v1822_v6  ;;  %v1389_v6 = vld [vmem:[%s1995_s10] ss:$0 sm:$0xff] }
 0x223   :  { %1473 = vmatpush3.bf16.msra.mxu0 %v1636_v60 }
 0x2c6   :  { %v1414_v46 = vpop.f32.mrf.mxu0 }
 0x2c8   :  { %v1415_v48 = vpop.f32.mrf.mxu0 }
 0x2c9   :  { %v1416_v52 = vadd.f32 %v1415_v48, %v1414_v46 }
 0x2ca   :  { %v1417_v50 = vpop.f32.mrf.mxu0 }
 0x2cc   :  { %v1418_v51 = vpop.f32.mrf.mxu0 }
 0x2cd   :  { %v1419_v53 = vadd.f32 %v1418_v51, %v1417_v50 }
 0x2cf   :  { %v1027_v55 = vpack.c.bf16 %v1419_v53, %v1416_v52 }
 0x2d1   :  { %v1036_v56 = vadd.bf16 %v1035_v54, %v1027_v55 }
 0x2d3   :  { %v1037_v57 = vmax.bf16 %v1820_v0, %v1036_v56 }
 0x2d5   :  { %1455 = vmatmul.mubr.bf16.vlgmr.msra.gmra.mxu1 %v1037_v57 }
 0x395   :  { %v1136_v63 = vpop.f32.mrf.mxu1 }
 0x397   :  { %v1456_v1 = vpop.f32.mrf.mxu1 }
 0x399   :  { %v1139_v3 = vpop.f32.mrf.mxu1 }
 0x39a   :  { %v1143_v4 = vpack.c.bf16 %v1139_v3, %v1136_v63 }
 0x39b   :  { %v1457_v5 = vpop.f32.mrf.mxu1 }
 0x39c   :  { %v1152_v7 = vadd.bf16 %v1151_v2, %v1143_v4 }
 0x39e   :  { %v1153_v8 = vmax.bf16 %v1820_v0, %v1152_v7 }
 0x3a0   :  { %1475 = vmatmul.mubr.bf16.vlgmr.msra.gmra.mxu0 %v1153_v8 }
 0x460   :  { %v1259_v9 = vpop.f32.mrf.mxu0 }
 0x461   :  { %v1260_v10 = vadd.f32 %v1389_v6, %v1259_v9 }
 0x462   :  { %v1476_v11 = vpop.f32.mrf.mxu0 }
 0x463   :  { %1266 = vst [vmem:[#allocation14] sm:$0xff] %v1260_v10 }
 0x464   :  { %v1262_v12 = vpop.f32.mrf.mxu0 }
 0x465   :  { %v1263_v13 = vadd.f32 %v1389_v6, %v1262_v12 }
 0x466   :  { %v1477_v24 = vpop.f32.mrf.mxu0 }
 0x467   :  { %1267 = vst [vmem:[#allocation14 + $0x8] sm:$0xff] %v1263_v13 }
 0x468   :  { %1788 = shalt.err (!%p1785_p11)
}
 0x469   :  { %1279 = dma.vmem_to_hbm [thread:$0]  %s1274_s19, 256, %s1996_s11, [#allocation4], %s1811_s27, %s1811_s27, %s1812_s28  }
 0x46a   :  { %1805 = dma.done.wait [#allocation4], 256  }
 0x46b   :  { %1806 = vsyncadd [#allocation4], 4294967040 }
 0x46c   :  { %1283 = vsyncpa [#allocation3], 1 }
 0x46d   :  { %1284 = vsyncpa [#allocation6], 1 }
 0x46e   :  { %1285 = vsyncpa [#allocation9], 1 }
 0x46f   :  { %1286 = vsyncpa [#allocation12], 1 }
 0x470   :  { %1287 = vsyncpa [#allocation4], 1 }

</bundles_post_ra>
